<compile_context>
chip_gen: v7x
topology: tpu7x:2x2x1
jax: 0.10.0
libtpu: 0.0.40
codegen_flags: <defaults>
</compile_context>

<pallas_src>
import jax
import jax.numpy as jnp
from jax.experimental import pallas as pl
from jax.experimental.pallas import tpu as pltpu


def _mlp_kernel(x_ref, w1_ref, w2_ref, b_ref, o_ref):
    # x_ref : (C, tn)        w1_ref: (H, C)        w2_ref: (C_out, H)
    # b_ref : (C_out, 1) f32                       o_ref : (C_out, tn)
    h = jnp.dot(w1_ref[...], x_ref[...], preferred_element_type=jnp.float32)
    y = jnp.dot(w2_ref[...], h.astype(w2_ref.dtype),
                preferred_element_type=jnp.float32)
    y = y + b_ref[...]                    # per-channel bias, broadcast over lanes
    o_ref[...] = y.astype(o_ref.dtype)


def mlp_pallas(x, params, *, tn=None, compute_dtype=jnp.bfloat16):
    """x: (T, B, C_in, N). Returns (T, B, C_out, N) in x.dtype."""
    (w1, b1, g1, be1, m1, v1, w2, b2, g2, be2, m2, v2) = params
    T, B, C, N = x.shape
    H = w1.shape[0]
    C_out = w2.shape[0]
    eps = 1e-5

    # ---- Fold conv bias + eval-mode BN into the weights and one output bias.
    s1 = g1 / jnp.sqrt(v1 + eps)
    sh1 = be1 + s1 * (b1 - m1)                         # (H,)
    s2 = g2 / jnp.sqrt(v2 + eps)
    sh2 = be2 + s2 * (b2 - m2)                         # (C_out,)
    w1f = (s1[:, None] * w1).astype(jnp.float32)       # (H, C)
    w2f = (s2[:, None] * w2).astype(jnp.float32)       # (C_out, H)
    bias = (w2f @ sh1 + sh2).reshape(C_out, 1).astype(jnp.float32)

    # ---- Lane tiling over N (pad the tail instead of asserting divisibility).
    if tn is None:
        tn = N if N <= 512 else 512
    n_tiles = pl.cdiv(N, tn)
    Np = n_tiles * tn

    xr = x.reshape(T * B, C, N)                        # free reshape, no transpose
    if Np != N:
        xr = jnp.pad(xr, ((0, 0), (0, 0), (0, Np - N)))
    xr = xr.astype(compute_dtype)

    # ---- VMEM budget: double-buffered x/out tiles + resident weights/bias.
    cbytes = jnp.dtype(compute_dtype).itemsize
    obytes = jnp.dtype(x.dtype).itemsize
    vmem_est = 2 * (C * tn * cbytes + C_out * tn * obytes
                    + H * C * cbytes + C_out * H * cbytes + C_out * 4)
    vmem_limit = int(min(max(2 * vmem_est, 32 * 1024 * 1024), 48 * 1024 * 1024))

    grid = (T * B, n_tiles)
    out = pl.pallas_call(
        _mlp_kernel,
        out_shape=jax.ShapeDtypeStruct((T * B, C_out, Np), x.dtype),
        grid_spec=pltpu.PrefetchScalarGridSpec(
            num_scalar_prefetch=0,
            grid=grid,
            in_specs=[
                pl.BlockSpec((None, C, tn), lambda b, n: (b, 0, n)),   # x slab
                pl.BlockSpec((H, C), lambda b, n: (0, 0)),             # W1' (resident)
                pl.BlockSpec((C_out, H), lambda b, n: (0, 0)),         # W2' (resident)
                pl.BlockSpec((C_out, 1), lambda b, n: (0, 0)),         # folded bias
            ],
            out_specs=pl.BlockSpec((None, C_out, tn), lambda b, n: (b, 0, n)),
        ),
        compiler_params=pltpu.CompilerParams(
            dimension_semantics=("parallel", "parallel"),
            vmem_limit_bytes=vmem_limit),
    )(
        xr,
        w1f.astype(compute_dtype),
        w2f.astype(compute_dtype),
        bias,
    )

    out = out.reshape(T, B, C_out, Np)
    if Np != N:
        out = out[..., :N]
    return out


def mlp_reference(x, params):
    """Pure-JAX reference mirroring the PyTorch forward (BN in eval mode)."""
    (w1, b1, g1, be1, m1, v1, w2, b2, g2, be2, m2, v2) = params
    T, B, C, N = x.shape
    eps = 1e-5
    xf = x.reshape(T * B, C, N)
    h = jnp.einsum("bcn,hc->bhn", xf, w1) + b1[None, :, None]
    h = (g1[None, :, None] * (h - m1[None, :, None])
         / jnp.sqrt(v1 + eps)[None, :, None] + be1[None, :, None])
    y = jnp.einsum("bhn,oh->bon", h, w2) + b2[None, :, None]
    y = (g2[None, :, None] * (y - m2[None, :, None])
         / jnp.sqrt(v2 + eps)[None, :, None] + be2[None, :, None])
    return y.reshape(T, B, -1, N)


def make_params(key, in_features, hidden_features, out_features):
    ks = jax.random.split(key, 6)
    w1 = jax.random.normal(ks[0], (hidden_features, in_features), jnp.float32) * 0.1
    b1 = jax.random.normal(ks[1], (hidden_features,), jnp.float32) * 0.1
    g1 = 1.0 + 0.1 * jax.random.normal(ks[2], (hidden_features,), jnp.float32)
    be1 = 0.1 * jax.random.normal(ks[3], (hidden_features,), jnp.float32)
    m1 = 0.05 * jnp.arange(hidden_features, dtype=jnp.float32)
    v1 = 1.0 + 0.01 * jnp.arange(hidden_features, dtype=jnp.float32)
    w2 = jax.random.normal(ks[4], (out_features, hidden_features), jnp.float32) * 0.1
    b2 = jax.random.normal(ks[5], (out_features,), jnp.float32) * 0.1
    g2 = jnp.linspace(0.9, 1.1, out_features, dtype=jnp.float32)
    be2 = jnp.linspace(-0.1, 0.1, out_features, dtype=jnp.float32)
    m2 = 0.02 * jnp.arange(out_features, dtype=jnp.float32)
    v2 = 1.0 + 0.02 * jnp.arange(out_features, dtype=jnp.float32)
    return (w1, b1, g1, be1, m1, v1, w2, b2, g2, be2, m2, v2)


if __name__ == "__main__":
    key = jax.random.PRNGKey(0)
    kx, kp = jax.random.split(key)

    T, B, C, N = 2, 2, 4, 128          # small shapes; N=128 keeps lanes dense
    hidden = 32
    out_features = C                   # out_features defaults to in_features

    x = jax.random.normal(kx, (T, B, C, N), jnp.float32)
    params = make_params(kp, C, hidden, out_features)

    y_ref = mlp_reference(x, params)

    # f32 compute path: strict check against the reference.
    y32 = mlp_pallas(x, params, compute_dtype=jnp.float32)
    jax.block_until_ready(y32)
    assert y32.shape == (T, B, out_features, N)
    assert jnp.allclose(y32, y_ref, atol=1e-4, rtol=1e-4), "f32 mismatch vs reference"

    # bf16 MXU path (default): looser tolerance for bf16 quantization.
    ybf = mlp_pallas(x, params)
    jax.block_until_ready(ybf)
    assert ybf.shape == (T, B, out_features, N)
    assert jnp.allclose(ybf.astype(jnp.float32), y_ref, atol=3e-2, rtol=3e-2), \
        "bf16 mismatch vs reference"

    print("KERNEL_OK")
</pallas_src>

<mosaic_0001>
module attributes {stable_mosaic.version = 11 : i64} {
  func.func @_mlp_kernel(%arg0: i32, %arg1: i32, %arg2: memref<1x4x128xf32, #tpu.memory_space<vmem>>, %arg3: memref<32x4xf32, #tpu.memory_space<vmem>>, %arg4: memref<4x32xf32, #tpu.memory_space<vmem>>, %arg5: memref<4x1xf32, #tpu.memory_space<vmem>>, %arg6: memref<1x4x128xf32, #tpu.memory_space<vmem>>) attributes {dimension_semantics = [#tpu.dimension_semantics<parallel>, #tpu.dimension_semantics<parallel>], iteration_bounds = array<i64: 4, 1>, scalar_prefetch = 0 : i64, scratch_operands = 0 : i64, tpu.core_type = #tpu.core_type<tc>, window_params = [{transform_indices = @transform_0, window_bounds = array<i64: 1, 4, 128>}, {pipeline_mode = #tpu.pipeline_mode<synchronous>, transform_indices = @transform_1, window_bounds = array<i64: 32, 4>}, {pipeline_mode = #tpu.pipeline_mode<synchronous>, transform_indices = @transform_2, window_bounds = array<i64: 4, 32>}, {pipeline_mode = #tpu.pipeline_mode<synchronous>, transform_indices = @transform_3, window_bounds = array<i64: 4, 1>}, {transform_indices = @transform_4, window_bounds = array<i64: 1, 4, 128>}]} {
    %c0 = arith.constant 0 : index
    %c0_0 = arith.constant 0 : index
    %0 = vector.load %arg3[%c0, %c0_0] : memref<32x4xf32, #tpu.memory_space<vmem>>, vector<32x4xf32>
    %c0_1 = arith.constant 0 : index
    %c0_2 = arith.constant 0 : index
    %c0_3 = arith.constant 0 : index
    %1 = vector.load %arg2[%c0_1, %c0_2, %c0_3] : memref<1x4x128xf32, #tpu.memory_space<vmem>>, vector<1x4x128xf32>
    %2 = vector.shape_cast %1 : vector<1x4x128xf32> to vector<4x128xf32>
    %cst = arith.constant dense<0.000000e+00> : vector<32x128xf32>
    %3 = tpu.matmul %0, %2, %cst {dimension_numbers = #tpu.dot_dimension_numbers<[1], [0], [0], [1], [0, 0, 1, 1], [], []>} : vector<32x4xf32>, vector<4x128xf32>, vector<32x128xf32> -> vector<32x128xf32>
    %c0_4 = arith.constant 0 : index
    %c0_5 = arith.constant 0 : index
    %4 = vector.load %arg4[%c0_4, %c0_5] : memref<4x32xf32, #tpu.memory_space<vmem>>, vector<4x32xf32>
    %cst_6 = arith.constant dense<0.000000e+00> : vector<4x128xf32>
    %5 = tpu.matmul %4, %3, %cst_6 {dimension_numbers = #tpu.dot_dimension_numbers<[1], [0], [0], [1], [0, 0, 1, 1], [], []>} : vector<4x32xf32>, vector<32x128xf32>, vector<4x128xf32> -> vector<4x128xf32>
    %c0_7 = arith.constant 0 : index
    %c0_8 = arith.constant 0 : index
    %6 = vector.load %arg5[%c0_7, %c0_8] : memref<4x1xf32, #tpu.memory_space<vmem>>, vector<4x1xf32>
    %7 = vector.broadcast %6 : vector<4x1xf32> to vector<4x128xf32>
    %8 = arith.addf %5, %7 : vector<4x128xf32>
    %c0_9 = arith.constant 0 : index
    %c0_10 = arith.constant 0 : index
    %c0_11 = arith.constant 0 : index
    %9 = vector.load %arg6[%c0_9, %c0_10, %c0_11] : memref<1x4x128xf32, #tpu.memory_space<vmem>>, vector<1x4x128xf32>
    %10 = vector.shape_cast %9 : vector<1x4x128xf32> to vector<4x128xf32>
    %11 = vector.shape_cast %8 : vector<4x128xf32> to vector<1x4x128xf32>
    tpu.vector_store %arg6[%c0_9, %c0_10, %c0_11], %11 {strides = array<i32>} : memref<1x4x128xf32, #tpu.memory_space<vmem>>, vector<1x4x128xf32>,
    return
  }
  func.func @transform_0(%arg0: i32, %arg1: i32) -> (i32, i32, i32) {
    %c0_i32 = arith.constant 0 : i32
    %c0_i32_0 = arith.constant 0 : i32
    return %arg0, %c0_i32, %arg1 : i32, i32, i32
  }
  func.func @transform_1(%arg0: i32, %arg1: i32) -> (i32, i32) {
    %c0_i32 = arith.constant 0 : i32
    %c0_i32_0 = arith.constant 0 : i32
    %c0_i32_1 = arith.constant 0 : i32
    return %c0_i32, %c0_i32_0 : i32, i32
  }
  func.func @transform_2(%arg0: i32, %arg1: i32) -> (i32, i32) {
    %c0_i32 = arith.constant 0 : i32
    %c0_i32_0 = arith.constant 0 : i32
    %c0_i32_1 = arith.constant 0 : i32
    return %c0_i32, %c0_i32_0 : i32, i32
  }
  func.func @transform_3(%arg0: i32, %arg1: i32) -> (i32, i32) {
    %c0_i32 = arith.constant 0 : i32
    %c0_i32_0 = arith.constant 0 : i32
    %c0_i32_1 = arith.constant 0 : i32
    return %c0_i32, %c0_i32_0 : i32, i32
  }
  func.func @transform_4(%arg0: i32, %arg1: i32) -> (i32, i32, i32) {
    %c0_i32 = arith.constant 0 : i32
    %c0_i32_0 = arith.constant 0 : i32
    return %arg0, %c0_i32, %arg1 : i32, i32, i32
  }
}

</mosaic_0001>

<bundles_post_ra>
// kernel: tpu_custom_call.1
= control target key start
LH: loop header
LB: loop body
LE: loop exit
PB: predicated region body
PF: predicated region fallthrough
CT: control target
= control target key end

     0   :  { %9 = vsyncpa [#allocation3], 0  ;;  %s845_s0 = inlined_call_operand.vmem [shape: f32[4,4,128], index: 0, kind: input, shape index: {}]   ;;  %s846_s1 = inlined_call_operand.vmem [shape: f32[32,4], index: 1, kind: input, shape index: {}]   ;;  %s847_s2 = inlined_call_operand.vmem [shape: f32[4,32], index: 2, kind: input, shape index: {}]   ;;  %s848_s3 = inlined_call_operand.vmem [shape: f32[4,1], index: 3, kind: input, shape index: {}]   ;;  %s849_s4 = inlined_call_operand.hbm [shape: f32[4,4,128], index: 4, kind: output, shape index: {}]  }
   0x1   :  { %11 = vsyncpa [#allocation3 + $0x1], 0  ;;  %s715_s15 = smov 0   ;;  %s717_s16 = smov 0  }
   0x2   :  { %s719_s17 = smov 0   ;;  %s721_s18 = smov 0  }
   0x3   :  { %s723_s19 = smov 0   ;;  %s725_s20 = smov 0  }
   0x4 LB: > { %s493_s21 = sadd.s32 4294967295, %s683_s20   ;;  %s494_s22 = sadd.s32 4294967294, %s683_s20   ;;  %s683_s20 = sphi %s725_s20, %s17_s20   ;;  %s679_s19 = sphi %s723_s19, %s856_s19   ;;  %s675_s18 = sphi %s721_s18, %s855_s18   ;;  %s671_s17 = sphi %s719_s17, %s854_s17   ;;  %s667_s16 = sphi %s717_s16, %s853_s16   ;;  %s663_s15 = sphi %s715_s15, %s852_s15  }
   0x5   : > { %s29_s23 = sadd.s32 1, %s679_s19  ;;  %s129_s24 = sadd.s32 1, %s671_s17 }
   0x6   : > { %p31_p0 = scmp.ge.s32.totalorder %s29_s23, 4  ;;  %p139_p1 = scmp.ne.s32.totalorder %s671_s17, %s667_s16 }
   0x7   : > { %p140_p2 = scmp.eq.s32.totalorder %s493_s21, 3  ;;  %p145_p3 = scmp.ne.s32.totalorder %s667_s16, %s663_s15 }
   0x8   : > { %s858_s23 = smov (%p31_p0, %s29_s23), 0  ;;  %p146_p5 = scmp.eq.s32.totalorder %s494_s22, 3 }
   0x9   : > { %p755_p4 = por %p140_p2, %p139_p1  ;;  %s124_s26 = ssub.s32 %s679_s19, %s858_s23 }
   0xa   : > { %p497_p6 = scmp.ge.s32.totalorder %s683_s20, 1  ;;  %p127_p7 = scmp.eq.s32.totalorder %s124_s26, 0 }
   0xb   : > { %p762_p8 = por %p146_p5, %p145_p3  ;;  %p183_p9 = scmp.lt.s32.totalorder %s683_s20, 5 }
   0xc   : > { %s768_s28 = scalar_select %p127_p7, %s671_s17, %s129_s24  }
   0xd   : > { %p184_p10 = pnand %p497_p6, %p183_p9 }
   0xe   : > { %p211_p11 = scmp.lt.s32.totalorder (!%p184_p10), %s675_s18, 3  ;;  %v218_v0 = vld [vmem:[%s846_s1] sm:$0xff] (!%p184_p10)  ;;  %vm223_vm0 = vcmask (!%p184_p10), 31744   ;;  %vm236_vm1 = vcmask (!%p184_p10), 1043456   ;;  %v219_v2 = vld [vmem:[%s846_s1 + $0x8] sm:$0xff] (!%p184_p10)  ;;  %v220_v3 = vld [vmem:[%s846_s1 + $0x10] sm:$0xff] (!%p184_p10) }
   0xf   : > { %187 = sbr.rel (%p184_p10) target bundleno = 479 (0x1df), region = 36  ;;  %522 = vmatprep.mubr.msk.f32.mxu0 (!%p184_p10), %vm223_vm0, %v218_v0  ;;  %v221_v4 = vld [vmem:[%s846_s1 + $0x18] sm:$0xff] (!%p184_p10)  ;;  %v685_v5 = vmov (!%p184_p10), 0.0|0.0   ;;  %vm686_vm2 = vmmov (!%p184_p10), 0   ;;  %v687_v6 = vmov (!%p184_p10), 0.0   ;;  %v688_v8 = vmov (!%p184_p10), 0  }
  0x10   : > { %539 = vmatprep.subr.bf16.mxu1 (!%p184_p10), %v685_v5  ;;  %536 = vmatprep.mubr.msk.f32.mxu1 (!%p184_p10), %vm686_vm2, %v687_v6  ;;  %v326_v7 = vld [vmem:[%s848_s3] sm:$0xf] (!%p184_p10)  ;;  %vm332_vm3 = vcmask (!%p184_p10), 261120   ;;  %s208_s30 = sand.u32 (!%p184_p10), 1, %s667_s16  }
  0x11   : > { %604 = vset.pattern.permute.xlu0 (!%p184_p10), %v688_v8  ;;  %v325_v15 = vld [vmem:[%s847_s2] sm:$0xf] (!%p184_p10)  ;;  %s408_s12 = scalar_lea.sflag (!%p184_p10), [#allocation3], %s208_s30 }
  0x12   : > { %329 = vperm.xlu0 (!%p184_p10), %604, %v326_v7  }
  0x16   : > { %s212_s5 = scalar_select %p211_p11, %s675_s18, 3 }
  0x18   : > { %s499_s6 = sshll.u32 %s212_s5, 2  ;;  %s498_s5 = sshll.u32 %s208_s30, 2 }
  0x19   : > { %s217_s9 = scalar_lea.vmem %s845_s0, %s499_s6  ;;  %s507_s6 = sshll.u32 %s675_s18, 6 }
  0x1a   : > { %v222_v1 = vld [vmem:[%s217_s9] sm:$0xf]  ;;  %s210_s7 = scalar_lea.vmem [#allocation2], %s498_s5  ;;  %s798_s11 = scalar_lea.hbm %s849_s4, %s507_s6 }
  0x1b   : > { %520 = vmatprep.subr.msk.mxu0 %vm236_vm1, %v222_v1  ;;  %s422_s8 = sshll.u32 %s210_s7, 4  ;;  %s689_s18 = smov [#allocation2]   ;;  %s800_s8 = int_to_ptr.vmem [resolvable:$true] %s422_s8 }
  0x1c   : > { %521 = vmatpush3.msk.msra.mxu0 %vm236_vm1, %v222_v1  ;;  %s605_s13 = scalar_lea.vmem %s800_s8, 64  ;;  %s609_s14 = sshll.u32 %s689_s18, 4  ;;  %s610_s14 = int_to_ptr.vmem [resolvable:$false] %s609_s14 }
  0x1d   : > { %523 = vmatmul.mubr.msk.f32.vlgmr.msra.gmra.mrb[0].mxu0 %vm223_vm0, %v219_v2  ;;  %p606_p12 = scmp.ne.s32.totalorder %s800_s8, %s605_s13  ;;  %s611_s21 = scalar_lea.vmem %s610_s14, 128 }
  0x1e   : > { %525 = vmatprep.mubr.msk.f32.mxu0 %vm223_vm0, %v220_v3  ;;  %p612_p1 = scmp.lt.s32.totalorder %s800_s8, %s610_s14  ;;  %p613_p2 = scmp.lt.s32.totalorder %s611_s21, %s605_s13 }
  0x1f   : > { %p607_p13 = pnand %p606_p12, %p755_p4 }
  0x20   : > { %p614_p3 = por %p613_p2, %p612_p1 }
  0x21   : > { %526 = vmatmul.mubr.msk.f32.gmra.mrb[2].mxu0 %vm223_vm0, %v221_v4  ;;  %p608_p0 = pneg %p607_p13 }
  0x23   : > { %p615_p5 = pnand %p614_p3, %p608_p0 }
  0x91   : > { %v330_v16 = vpop.permute.xlu0 %329 }
  0xf0   : > { %v524_v9 = vpop.f32.mrb[0].mxu0 }
  0xf1   : > { %v306_v10 = vpop.f32.mrb[1].mxu0 }
  0xf2   : > { %v540_v11 = vpack.c.bf16 %v524_v9, %v306_v10 }
  0xf4   : > { %v527_v12 = vpop.f32.mrb[2].mxu0  ;;  %541 = vmatpush3.bf16.msra.mxu1 %v540_v11 }
  0xf5   : > { %v316_v13 = vpop.f32.mrb[3].mxu0  ;;  %542 = vmatprep.subr.bf16.mxu1 %v685_v5 }
  0xf6   : > { %v543_v14 = vpack.c.bf16 %v527_v12, %v316_v13 }
  0xf8   : > { %544 = vmatpush3.bf16.msra.mxu1 %v543_v14 }
  0xfb   : > { %537 = vmatmul.mubr.msk.f32.vlgmr.msra.gmra.mrb[0].mxu1 %vm332_vm3, %v325_v15 }
 0x1ce   : > { %v402_v17 = vpop.f32.mrb[0].mxu1 }
 0x1cf   : > { %v403_v18 = vadd.f32 %v402_v17, %v330_v16  ;;  %v538_v19 = vpop.f32.mrb[1].mxu1 }
 0x1d1   : > { %406 = vst [vmem:[%s210_s7] sm:$0xf] %v403_v18 }
 0x1d2   : > { %618 = shalt.err (!%p615_p5)
}
 0x1d3   : > { %s619_s22 = scalar_lea.hbm %s798_s11, 64  ;;  %s623_s29 = scalar_lea.hbm %s849_s4, 256 }
 0x1d4   : > { %p620_p6 = scmp.ne.s32.totalorder %s798_s11, %s619_s22  ;;  %p624_p10 = scmp.lt.u32.totalorder %s798_s11, %s849_s4 }
 0x1d5   : > { %p625_p11 = scmp.lt.u32.totalorder %s623_s29, %s619_s22  ;;  %p627_p13 = scmp.lt.u32.totalorder %s619_s22, %s798_s11 }
 0x1d6   : > { %p621_p7 = pnand %p620_p6, %p755_p4 }
 0x1d7   : > { %p626_p12 = por %p625_p11, %p624_p10 }
 0x1d8   : > { %p622_p9 = pneg %p621_p7 }
 0x1d9   : > { %p628_p0 = por %p627_p13, %p626_p12 }
 0x1db   : > { %p629_p1 = pnand %p628_p0, %p622_p9 }
 0x1dd   : > { %632 = shalt.err (!%p629_p1)
}
 0x1de   : > { %545 = dma.vmem_to_hbm [thread:$0]  (%p755_p4), %s800_s8, 64, %s798_s11, %s408_s12  }
 0x1df PF: > { %p551_p2 = scmp.ge.s32.totalorder %s683_s20, 2  ;;  %s434_s6 = sand.u32 1, %s663_s15  }
 0x1e0   : > { %s435_s7 = scalar_lea.sflag [#allocation3], %s434_s6 }
 0x1e1   : > { %p548_p3 = pnand %p551_p2, %p762_p8 }
 0x1e3   : > { %658 = dma.done.wait (!%p548_p3), %s435_s7, 64  }
 0x1e4   : > { %660 = vsyncadd (!%p548_p3), %s435_s7, 4294967232  ;;  %s17_s20 = sadd.s32 1, %s683_s20   ;;  %s852_s15 = smov %s667_s16 }
 0x1e5   : > { %p14_p5 = scmp.ge.s32.totalorder %s17_s20, 6   ;;  %s853_s16 = smov %s671_s17 }
 0x1e6   : > { %s854_s17 = smov %s768_s28  ;;  %s855_s18 = smov %s679_s19 }
 0x1e7   : > { %s856_s19 = smov %s858_s23  ;;  %16 = sbr.rel (!%p14_p5) target bundleno = 4 (0x4), region = 71 }
 0x1ee   :  { %440 = vsyncpa [#allocation3], 1 }
 0x1ef   :  { %442 = vsyncpa [#allocation3 + $0x1], 1 }

</bundles_post_ra>
